<compile_context>
chip_gen: v7x
topology: tpu7x:2x2x1
jax: 0.10.0
libtpu: 0.0.40
codegen_flags: <defaults>
</compile_context>

<pallas_src>
import functools
import os

import jax
import jax.numpy as jnp
from jax import lax
from jax.experimental import pallas as pl
from jax.experimental.pallas import tpu as pltpu

NUM_HEADS = int(os.getenv("NUM_HEADS", "4"))

LANE = 128


def _round_up(x, m):
    return (x + m - 1) // m * m


def _vmem_capacity_bytes():
    """Physical VMEM of the local part (v5e/v6e: 128 MiB, v7x: 64 MiB per TC)."""
    try:
        cap = getattr(pltpu.get_tpu_info(), "vmem_capacity_bytes", None)
        if cap:
            return int(cap)
    except Exception:
        pass
    return 64 << 20          # conservative fallback (v7x per-TensorCore)


def _score_vmem_est(tq, s, sp, hd_pad, cdt_size, out_size):
    """Score-kernel per-step VMEM working set (includes softmax temporaries)."""
    return (2 * tq * hd_pad * cdt_size        # g blocks (double-buffered)
            + 2 * sp * hd_pad * cdt_size      # k blocks (double-buffered)
            + 2 * tq * s * out_size           # output blocks (double-buffered)
            + 2 * tq * sp * 4)                # f32 score / exp temporaries


def _proj_vmem_est(sp, f, hd_pad, cdt_size):
    return (2 * 2 * sp * f * cdt_size          # x, mask blocks
            + 2 * 2 * sp * hd_pad * cdt_size   # g, k output blocks
            + 3 * sp * hd_pad * 4              # f32 qk / dep intermediates
            + 2 * (3 * f * hd_pad * cdt_size + 3 * hd_pad * 4))   # weights/biases


def _choose_tq(s, hd_pad, cdt_size, out_size, vmem_cap, max_tq):
    """Largest multiple-of-8 query tile whose score working set fits VMEM."""
    budget = int(0.70 * vmem_cap)
    tq = _round_up(min(max_tq, _round_up(s, 8)), 8)
    while tq > 8:
        sp = _round_up(s, tq)
        if _score_vmem_est(tq, s, sp, hd_pad, cdt_size, out_size) <= budget:
            break
        tq = max(8, _round_up(tq // 2, 8))
    return tq


def _compiler_params(semantics, est_bytes, vmem_cap):
    kwargs = dict(dimension_semantics=semantics)
    # Default scoped VMEM is 16 MiB (v5e) / 32 MiB (v6e, v7x); raise it only
    # when the working set gets close, never past ~85% of physical / 100 MiB.
    if est_bytes > (10 << 20):
        cap = min(int(0.85 * vmem_cap), 100 << 20)
        want = max(_round_up(int(1.4 * est_bytes), 1 << 20), 32 << 20)
        kwargs["vmem_limit_bytes"] = int(min(cap, want))
    return pltpu.CompilerParams(**kwargs)


# --------------------------------------------------------------------------- #
# Stage 1: projections (per batch element).
# --------------------------------------------------------------------------- #
def _proj_kernel(x_ref, mask_ref, wqk_ref, bqk_ref, wd_ref, bd_ref,
                 g_ref, k_ref, *, hd_pad):
    """Grid = (batch,). Computes g = Wdep(mask) * Wq(x) and k = Wk(x)."""
    x = x_ref[0]                                     # (SP, F) compute dtype
    m = mask_ref[0]                                  # (SP, F) compute dtype
    # Fused [Wq | Wk] projection: one wide MXU matmul, f32 accumulation.
    qk = jnp.dot(x, wqk_ref[...],
                 preferred_element_type=jnp.float32) + bqk_ref[...]
    q = qk[:, :hd_pad]                               # lane-aligned (hd_pad%128==0)
    k = qk[:, hd_pad:]
    dep = jnp.dot(m, wd_ref[...],
                  preferred_element_type=jnp.float32) + bd_ref[...]
    g_ref[0] = (dep * q).astype(g_ref.dtype)         # dep-gated query
    k_ref[0] = k.astype(k_ref.dtype)
    # TODO(synk): the PyTorch module also computes v = Wv(x) and holds a rotary
    # embedding, but forward() never uses either; both are dropped here.


# --------------------------------------------------------------------------- #
# Stage 2: attention scores (batch x query-tile, fully parallel grid).
# --------------------------------------------------------------------------- #
def _score_kernel(g_ref, k_ref, score_ref, *, seq_len, approx_recip):
    """Grid = (batch, query_tile); both axes 'parallel' (no cross-step state)."""
    g = g_ref[0]                                     # (TQ, HD_pad)
    k = k_ref[0]                                     # (SP, HD_pad)
    # Contract the feature dim of both operands -> no k transpose (no XLU work).
    s = lax.dot_general(g, k, dimension_numbers=(((1,), (1,)), ((), ())),
                        preferred_element_type=jnp.float32)     # (TQ, SP)
    sp = k.shape[0]
    if sp > seq_len:                                 # static: padded key columns
        col = lax.broadcasted_iota(jnp.int32, s.shape, 1)
        s = jnp.where(col < seq_len, s, jnp.float32(-1e30))
    # Row softmax in f32 (v5e has no bf16 VPU/EUP path).  Note: approx_recip=True
    # means rows sum to 1 only to EUP precision; pass False for exact softmax.
    s_max = jnp.max(s, axis=-1, keepdims=True)
    e = jnp.exp(s - s_max)
    denom = jnp.sum(e, axis=-1, keepdims=True)
    probs = e * pl.reciprocal(denom, approx=approx_recip)
    if sp > seq_len:
        probs = probs[:, :seq_len]
    score_ref[0] = probs.astype(score_ref.dtype)


# --------------------------------------------------------------------------- #
# Wrapper
# --------------------------------------------------------------------------- #
def selfdep_attention(x, mask, params, *, compute_dtype=jnp.bfloat16,
                      out_dtype=jnp.float32, approx_recip=True, max_tq=1024):
    B, S, F = x.shape
    HD = params["wq"].shape[1]
    hd_pad = _round_up(HD, LANE)
    cdt = jnp.dtype(compute_dtype)
    odt = jnp.dtype(out_dtype)

    vmem_cap = _vmem_capacity_bytes()
    tq = _choose_tq(S, hd_pad, cdt.itemsize, odt.itemsize, vmem_cap, max_tq)
    sp = _round_up(S, tq)            # padded query length (multiple of tq)
    nq = sp // tq

    def pad_w(w):
        return jnp.pad(w.astype(compute_dtype), ((0, 0), (0, hd_pad - HD)))

    def pad_b(b):
        return jnp.pad(b.astype(jnp.float32).reshape(1, HD),
                       ((0, 0), (0, hd_pad - HD)))

    # Fused [Wq | Wk]; HD zero-padded to a lane multiple (padded cols are zero,
    # so results are unchanged).
    wqk = jnp.concatenate([pad_w(params["wq"]), pad_w(params["wk"])], axis=1)
    bqk = jnp.concatenate([pad_b(params["bq"]), pad_b(params["bk"])], axis=1)
    wd = pad_w(params["wdep"])
    bd = pad_b(params["bdep"])

    # Cast activations to the compute dtype *in the wrapper* (halves their HBM
    # traffic) and zero-pad the query axis up to a TQ multiple.
    xin = x.astype(compute_dtype)
    msk = mask.astype(compute_dtype)
    if sp > S:
        xin = jnp.pad(xin, ((0, 0), (0, sp - S), (0, 0)))
        msk = jnp.pad(msk, ((0, 0), (0, sp - S), (0, 0)))

    # ---- Stage 1: projections -> g = dep*q and k staged in HBM (compute dtype).
    # TODO(synk): row-tile this projection kernel for extremely long sequences;
    # today it holds one batch element's full sequence in VMEM.
    proj_est = _proj_vmem_est(sp, F, hd_pad, cdt.itemsize)
    g, k = pl.pallas_call(
        functools.partial(_proj_kernel, hd_pad=hd_pad),
        out_shape=(jax.ShapeDtypeStruct((B, sp, hd_pad), compute_dtype),
                   jax.ShapeDtypeStruct((B, sp, hd_pad), compute_dtype)),
        grid=(B,),
        in_specs=[
            pl.BlockSpec((1, sp, F), lambda b: (b, 0, 0)),        # x
            pl.BlockSpec((1, sp, F), lambda b: (b, 0, 0)),        # mask
            pl.BlockSpec((F, 2 * hd_pad), lambda b: (0, 0)),      # [Wq | Wk]
            pl.BlockSpec((1, 2 * hd_pad), lambda b: (0, 0)),      # [bq | bk]
            pl.BlockSpec((F, hd_pad), lambda b: (0, 0)),          # Wdep
            pl.BlockSpec((1, hd_pad), lambda b: (0, 0)),          # bdep
        ],
        out_specs=(pl.BlockSpec((1, sp, hd_pad), lambda b: (b, 0, 0)),
                   pl.BlockSpec((1, sp, hd_pad), lambda b: (b, 0, 0))),
        compiler_params=_compiler_params(("parallel",), proj_est, vmem_cap),
    )(xin, msk, wqk, bqk, wd, bd)

    # ---- Stage 2: scores.  Both grid axes parallel (no scratch persistence),
    # so v7x can shard (batch, q-tile) across both TensorCores.
    score_est = _score_vmem_est(tq, S, sp, hd_pad, cdt.itemsize, odt.itemsize)
    out = pl.pallas_call(
        functools.partial(_score_kernel, seq_len=S, approx_recip=approx_recip),
        out_shape=jax.ShapeDtypeStruct((B, sp, S), out_dtype),
        grid=(B, nq),
        in_specs=[
            pl.BlockSpec((1, tq, hd_pad), lambda b, q: (b, q, 0)),   # g tile
            pl.BlockSpec((1, sp, hd_pad), lambda b, q: (b, 0, 0)),   # all keys
        ],
        out_specs=pl.BlockSpec((1, tq, S), lambda b, q: (b, q, 0)),
        compiler_params=_compiler_params(("parallel", "parallel"),
                                         score_est, vmem_cap),
    )(g, k)

    if sp > S:
        out = out[:, :S, :]      # drop padded query rows
    return out


def _reference(x, mask, params, compute_dtype=jnp.float32):
    """Plain-JAX reference mirroring the kernel's cast/accumulate recipe."""
    cdt = compute_dtype
    f32 = jnp.float32
    q = jnp.einsum("bsf,fd->bsd", x.astype(cdt), params["wq"].astype(cdt),
                   preferred_element_type=f32) + params["bq"]
    k = jnp.einsum("bsf,fd->bsd", x.astype(cdt), params["wk"].astype(cdt),
                   preferred_element_type=f32) + params["bk"]
    dep = jnp.einsum("bsf,fd->bsd", mask.astype(cdt), params["wdep"].astype(cdt),
                     preferred_element_type=f32) + params["bdep"]
    s = jnp.einsum("bid,bjd->bij", (dep * q).astype(cdt), k.astype(cdt),
                   preferred_element_type=f32)
    return jax.nn.softmax(s, axis=-1)


if __name__ == "__main__":
    B, S = 2, 8
    num_features = 32
    hid_dim = 8
    HD = hid_dim * NUM_HEADS

    key = jax.random.PRNGKey(0)
    keys = jax.random.split(key, 10)
    scale = 1.0 / jnp.sqrt(num_features)

    params = {
        "wq":   jax.random.normal(keys[0], (num_features, HD), jnp.float32) * scale,
        "bq":   jax.random.normal(keys[1], (1, HD), jnp.float32) * 0.01,
        "wk":   jax.random.normal(keys[2], (num_features, HD), jnp.float32) * scale,
        "bk":   jax.random.normal(keys[3], (1, HD), jnp.float32) * 0.01,
        "wdep": jax.random.normal(keys[4], (num_features, HD), jnp.float32) * scale,
        "bdep": jax.random.normal(keys[5], (1, HD), jnp.float32) * 0.01,
        # Wv / bv intentionally absent: the forward never uses V.
    }

    x = jax.random.normal(keys[6], (B, S, num_features), jnp.float32)
    mask = jax.random.normal(keys[7], (B, S, num_features), jnp.float32)

    ref_f32 = _reference(x, mask, params, jnp.float32)

    # 1) Exact f32 path (validation mode): must match the f32 reference tightly.
    score_f32 = jax.block_until_ready(
        selfdep_attention(x, mask, params,
                          compute_dtype=jnp.float32, approx_recip=False))
    assert score_f32.shape == (B, S, S)
    assert jnp.allclose(score_f32, ref_f32, atol=1e-5, rtol=1e-5), \
        "f32 kernel mismatch vs f32 reference"

    # 2) Default bf16 MXU path (perf mode, f32 output).
    score_bf16 = jax.block_until_ready(selfdep_attention(x, mask, params))
    ref_bf16 = _reference(x, mask, params, jnp.bfloat16)
    assert score_bf16.shape == (B, S, S)
    assert jnp.allclose(score_bf16, ref_bf16, atol=2e-2, rtol=2e-2), \
        "bf16 kernel mismatch vs bf16-matched reference"
    assert jnp.allclose(score_bf16, ref_f32, atol=1e-1, rtol=1e-1), \
        "bf16 kernel drifted too far from f32 reference"

    # 3) bf16 output path (halves the dominant (B,S,S) output write).
    score_bf16o = jax.block_until_ready(
        selfdep_attention(x, mask, params, out_dtype=jnp.bfloat16))
    assert score_bf16o.dtype == jnp.bfloat16
    assert jnp.allclose(score_bf16o.astype(jnp.float32), ref_f32,
                        atol=1e-1, rtol=1e-1), "bf16-output kernel mismatch"

    # 4) Ragged sequence length (exercises query-row padding + key masking).
    S2 = 12
    x2 = jax.random.normal(keys[8], (B, S2, num_features), jnp.float32)
    mask2 = jax.random.normal(keys[9], (B, S2, num_features), jnp.float32)
    ref2 = _reference(x2, mask2, params, jnp.float32)
    score2 = jax.block_until_ready(
        selfdep_attention(x2, mask2, params,
                          compute_dtype=jnp.float32, approx_recip=False))
    assert score2.shape == (B, S2, S2)
    assert jnp.allclose(score2, ref2, atol=1e-5, rtol=1e-5), \
        "ragged-S kernel mismatch vs f32 reference"

    print("KERNEL_OK")
</pallas_src>

<mosaic_0001>
module attributes {stable_mosaic.version = 11 : i64} {
  func.func @_proj_kernel(%arg0: i32, %arg1: memref<1x8x32xf32, #tpu.memory_space<vmem>>, %arg2: memref<1x8x32xf32, #tpu.memory_space<vmem>>, %arg3: memref<32x256xf32, #tpu.memory_space<vmem>>, %arg4: memref<1x256xf32, #tpu.memory_space<vmem>>, %arg5: memref<32x128xf32, #tpu.memory_space<vmem>>, %arg6: memref<1x128xf32, #tpu.memory_space<vmem>>, %arg7: memref<1x8x128xf32, #tpu.memory_space<vmem>>, %arg8: memref<1x8x128xf32, #tpu.memory_space<vmem>>) attributes {dimension_semantics = [#tpu.dimension_semantics<parallel>], iteration_bounds = array<i64: 2>, scalar_prefetch = 0 : i64, scratch_operands = 0 : i64, tpu.core_type = #tpu.core_type<tc>, window_params = [{transform_indices = @transform_0, window_bounds = array<i64: 1, 8, 32>}, {transform_indices = @transform_1, window_bounds = array<i64: 1, 8, 32>}, {pipeline_mode = #tpu.pipeline_mode<synchronous>, transform_indices = @transform_2, window_bounds = array<i64: 32, 256>}, {pipeline_mode = #tpu.pipeline_mode<synchronous>, transform_indices = @transform_3, window_bounds = array<i64: 1, 256>}, {pipeline_mode = #tpu.pipeline_mode<synchronous>, transform_indices = @transform_4, window_bounds = array<i64: 32, 128>}, {pipeline_mode = #tpu.pipeline_mode<synchronous>, transform_indices = @transform_5, window_bounds = array<i64: 1, 128>}, {transform_indices = @transform_6, window_bounds = array<i64: 1, 8, 128>}, {transform_indices = @transform_7, window_bounds = array<i64: 1, 8, 128>}]} {
    %c0 = arith.constant 0 : index
    %c0_0 = arith.constant 0 : index
    %c0_1 = arith.constant 0 : index
    %0 = vector.load %arg1[%c0, %c0_0, %c0_1] : memref<1x8x32xf32, #tpu.memory_space<vmem>>, vector<1x8x32xf32>
    %1 = vector.shape_cast %0 : vector<1x8x32xf32> to vector<8x32xf32>
    %c0_2 = arith.constant 0 : index
    %c0_3 = arith.constant 0 : index
    %c0_4 = arith.constant 0 : index
    %2 = vector.load %arg2[%c0_2, %c0_3, %c0_4] : memref<1x8x32xf32, #tpu.memory_space<vmem>>, vector<1x8x32xf32>
    %3 = vector.shape_cast %2 : vector<1x8x32xf32> to vector<8x32xf32>
    %c0_5 = arith.constant 0 : index
    %c0_6 = arith.constant 0 : index
    %4 = vector.load %arg3[%c0_5, %c0_6] : memref<32x256xf32, #tpu.memory_space<vmem>>, vector<32x256xf32>
    %cst = arith.constant dense<0.000000e+00> : vector<8x256xf32>
    %5 = tpu.matmul %1, %4, %cst {dimension_numbers = #tpu.dot_dimension_numbers<[1], [0], [0], [1], [0, 0, 1, 1], [], []>} : vector<8x32xf32>, vector<32x256xf32>, vector<8x256xf32> -> vector<8x256xf32>
    %c0_7 = arith.constant 0 : index
    %c0_8 = arith.constant 0 : index
    %6 = vector.load %arg4[%c0_7, %c0_8] : memref<1x256xf32, #tpu.memory_space<vmem>>, vector<1x256xf32>
    %7 = vector.broadcast %6 : vector<1x256xf32> to vector<8x256xf32>
    %8 = arith.addf %5, %7 : vector<8x256xf32>
    %9 = vector.extract_strided_slice %8 {offsets = [0, 0], sizes = [8, 128], strides = [1, 1]} : vector<8x256xf32> to vector<8x128xf32>
    %10 = vector.extract_strided_slice %8 {offsets = [0, 128], sizes = [8, 128], strides = [1, 1]} : vector<8x256xf32> to vector<8x128xf32>
    %c0_9 = arith.constant 0 : index
    %c0_10 = arith.constant 0 : index
    %11 = vector.load %arg5[%c0_9, %c0_10] : memref<32x128xf32, #tpu.memory_space<vmem>>, vector<32x128xf32>
    %cst_11 = arith.constant dense<0.000000e+00> : vector<8x128xf32>
    %12 = tpu.matmul %3, %11, %cst_11 {dimension_numbers = #tpu.dot_dimension_numbers<[1], [0], [0], [1], [0, 0, 1, 1], [], []>} : vector<8x32xf32>, vector<32x128xf32>, vector<8x128xf32> -> vector<8x128xf32>
    %c0_12 = arith.constant 0 : index
    %c0_13 = arith.constant 0 : index
    %13 = vector.load %arg6[%c0_12, %c0_13] : memref<1x128xf32, #tpu.memory_space<vmem>>, vector<1x128xf32>
    %14 = vector.broadcast %13 : vector<1x128xf32> to vector<8x128xf32>
    %15 = arith.addf %12, %14 : vector<8x128xf32>
    %16 = arith.mulf %15, %9 : vector<8x128xf32>
    %c0_14 = arith.constant 0 : index
    %c0_15 = arith.constant 0 : index
    %c0_16 = arith.constant 0 : index
    %17 = vector.load %arg7[%c0_14, %c0_15, %c0_16] : memref<1x8x128xf32, #tpu.memory_space<vmem>>, vector<1x8x128xf32>
    %18 = vector.shape_cast %17 : vector<1x8x128xf32> to vector<8x128xf32>
    %19 = vector.shape_cast %16 : vector<8x128xf32> to vector<1x8x128xf32>
    tpu.vector_store %arg7[%c0_14, %c0_15, %c0_16], %19 {strides = array<i32>} : memref<1x8x128xf32, #tpu.memory_space<vmem>>, vector<1x8x128xf32>,
    %c0_17 = arith.constant 0 : index
    %c0_18 = arith.constant 0 : index
    %c0_19 = arith.constant 0 : index
    %20 = vector.load %arg8[%c0_17, %c0_18, %c0_19] : memref<1x8x128xf32, #tpu.memory_space<vmem>>, vector<1x8x128xf32>
    %21 = vector.shape_cast %20 : vector<1x8x128xf32> to vector<8x128xf32>
    %22 = vector.shape_cast %10 : vector<8x128xf32> to vector<1x8x128xf32>
    tpu.vector_store %arg8[%c0_17, %c0_18, %c0_19], %22 {strides = array<i32>} : memref<1x8x128xf32, #tpu.memory_space<vmem>>, vector<1x8x128xf32>,
    return
  }
  func.func @transform_0(%arg0: i32) -> (i32, i32, i32) {
    %c0_i32 = arith.constant 0 : i32
    %c0_i32_0 = arith.constant 0 : i32
    %c0_i32_1 = arith.constant 0 : i32
    return %arg0, %c0_i32, %c0_i32_0 : i32, i32, i32
  }
  func.func @transform_1(%arg0: i32) -> (i32, i32, i32) {
    %c0_i32 = arith.constant 0 : i32
    %c0_i32_0 = arith.constant 0 : i32
    %c0_i32_1 = arith.constant 0 : i32
    return %arg0, %c0_i32, %c0_i32_0 : i32, i32, i32
  }
  func.func @transform_2(%arg0: i32) -> (i32, i32) {
    %c0_i32 = arith.constant 0 : i32
    %c0_i32_0 = arith.constant 0 : i32
    %c0_i32_1 = arith.constant 0 : i32
    return %c0_i32, %c0_i32_0 : i32, i32
  }
  func.func @transform_3(%arg0: i32) -> (i32, i32) {
    %c0_i32 = arith.constant 0 : i32
    %c0_i32_0 = arith.constant 0 : i32
    %c0_i32_1 = arith.constant 0 : i32
    return %c0_i32, %c0_i32_0 : i32, i32
  }
  func.func @transform_4(%arg0: i32) -> (i32, i32) {
    %c0_i32 = arith.constant 0 : i32
    %c0_i32_0 = arith.constant 0 : i32
    %c0_i32_1 = arith.constant 0 : i32
    return %c0_i32, %c0_i32_0 : i32, i32
  }
  func.func @transform_5(%arg0: i32) -> (i32, i32) {
    %c0_i32 = arith.constant 0 : i32
    %c0_i32_0 = arith.constant 0 : i32
    %c0_i32_1 = arith.constant 0 : i32
    return %c0_i32, %c0_i32_0 : i32, i32
  }
  func.func @transform_6(%arg0: i32) -> (i32, i32, i32) {
    %c0_i32 = arith.constant 0 : i32
    %c0_i32_0 = arith.constant 0 : i32
    %c0_i32_1 = arith.constant 0 : i32
    return %arg0, %c0_i32, %c0_i32_0 : i32, i32, i32
  }
  func.func @transform_7(%arg0: i32) -> (i32, i32, i32) {
    %c0_i32 = arith.constant 0 : i32
    %c0_i32_0 = arith.constant 0 : i32
    %c0_i32_1 = arith.constant 0 : i32
    return %arg0, %c0_i32, %c0_i32_0 : i32, i32, i32
  }
}

</mosaic_0001>

<bundles_post_ra>
// kernel: tpu_custom_call.1
= control target key start
LH: loop header
LB: loop body
LE: loop exit
PB: predicated region body
PF: predicated region fallthrough
CT: control target
= control target key end

     0   :  { %s1465_s0 = inlined_call_operand.hbm [shape: f32[2,8,32], index: 0, kind: input, shape index: {}]   ;;  %s1466_s1 = inlined_call_operand.hbm [shape: f32[2,8,32], index: 1, kind: input, shape index: {}]   ;;  %s1467_s2 = inlined_call_operand.hbm [shape: f32[32,256], index: 2, kind: input, shape index: {}]   ;;  %s1468_s3 = inlined_call_operand.vmem [shape: f32[1,256], index: 3, kind: input, shape index: {}]   ;;  %s1469_s4 = inlined_call_operand.hbm [shape: f32[32,128], index: 4, kind: input, shape index: {}]   ;;  %s1470_s5 = inlined_call_operand.vmem [shape: f32[1,128], index: 5, kind: input, shape index: {}]   ;;  %s1471_s6 = inlined_call_operand.hbm [shape: f32[2,8,128], index: 6, kind: output, shape index: {0}]   ;;  %s1472_s7 = inlined_call_operand.hbm [shape: f32[2,8,128], index: 7, kind: output, shape index: {1}]  }
   0x1   :  { %1478 = sst [smem:[#allocation21_spill]] %s1467_s2 }
   0x2   :  { %1479 = sst [smem:[#allocation22_spill]] %s1469_s4 }
   0x3   :  { %13 = vsyncpa [#allocation3], 0 }
   0x4   :  { %15 = vsyncpa [#allocation3 + $0x1], 0 }
   0x5   :  { %16 = vsyncpa [#allocation6], 0 }
   0x6   :  { %18 = vsyncpa [#allocation6 + $0x1], 0 }
   0x7   :  { %19 = vsyncpa [#allocation9], 0 }
   0x8   :  { %20 = vsyncpa [#allocation4], 0 }
   0x9   :  { %22 = vsyncpa [#allocation4 + $0x1], 0 }
   0xa   :  { %23 = vsyncpa [#allocation12], 0 }
   0xb   :  { %25 = vsyncpa [#allocation12 + $0x1], 0  ;;  %s1151_s24 = smov 0   ;;  %s1153_s25 = smov 0  }
   0xc   :  { %s1155_s26 = smov 0   ;;  %s1157_s27 = smov 0  }
   0xd LB: > { %1480 = sst [smem:[#allocation19_spill]] %s1092_s26  ;;  %s1172_s28 = sadd.s32 4294967295, %s1096_s27   ;;  %s1096_s27 = sphi %s1157_s27, %s1504_s27   ;;  %s1092_s26 = sphi %s1155_s26, %s1501_s26   ;;  %s1088_s25 = sphi %s1153_s25, %s1503_s25   ;;  %s1084_s24 = sphi %s1151_s24, %s1502_s24  }
   0xe   : > { %s731_s29 = sadd.s32 4294967294, %s1096_s27   ;;  %p51_p0 = scmp.ne.s32.totalorder %s1088_s25, %s1084_s24 }
   0xf   : > { %p1473_p1 = scmp.eq.s32.totalorder %s1172_s28, 0  ;;  %p191_p3 = scmp.eq.s32.totalorder %s731_s29, 1 }
  0x10   : > { %p732_p5 = scmp.ge.s32.totalorder %s1096_s27, 1  ;;  %p224_p7 = scmp.lt.s32.totalorder %s1096_s27, 3 }
  0x11   : > { %p1181_p4 = por %p1473_p1, %p51_p0  ;;  %p1186_p6 = por %p191_p3, %p51_p0 }
  0x12   : > { %p1191_p8 = pnand %p732_p5, %p224_p7  ;;  %s1098_s10 = smov [#allocation7]  }
  0x13   : > { %s1481_s30 = scalar_select %p1181_p4, 1, 0 }
  0x14   : > { %s1482_s8 = scalar_select %p1186_p6, 1, 0 }
  0x15   : > { %s1483_s9 = scalar_select %p1191_p8, 1, 0 }
  0x16   : > { %s236_s11 = sshll.u32 %s1098_s10, 4  ;;  %p802_p9 = pneg %p1191_p8  ;;  %s1195_s11 = int_to_ptr.vmem [resolvable:$true] %s236_s11 }
  0x17   : > { %s1099_s13 = smov [#allocation8]   ;;  %s1485_s2 = sld [smem:[#allocation21_spill]] }
  0x18   : > { %p1202_p11 = pnand %p802_p9, %p1473_p1  ;;  %s252_s14 = sshll.u32 %s1099_s13, 4  ;;  %s1206_s14 = int_to_ptr.vmem [resolvable:$true] %s252_s14 }
  0x1a   : > { %p872_p13 = pneg %p1202_p11 }
  0x1d   : > { %s870_s17 = scalar_lea.hbm %s1485_s2, 1024 }
  0x1e   : > { %p871_p12 = scmp.ne.s32.totalorder %s1485_s2, %s870_s17  ;;  %p877_p5 = scmp.lt.u32.totalorder %s870_s17, %s1485_s2 }
  0x20   : > { %p873_p0 = pnand %p872_p13, %p871_p12 }
  0x22   : > { %p874_p3 = pneg %p873_p0 }
  0x24   : > { %p879_p7 = pnand %p877_p5, %p874_p3 }
  0x26   : > { %882 = shalt.err (!%p879_p7)
}
  0x27   : > { %s883_s22 = scalar_lea.vmem %s1195_s11, 1024  ;;  %p891_p2 = scmp.lt.s32.totalorder %s1195_s11, %s1195_s11 }
  0x28   : > { %p884_p9 = scmp.ne.s32.totalorder %s1195_s11, %s883_s22  ;;  %p892_p12 = scmp.lt.s32.totalorder %s883_s22, %s883_s22 }
  0x2a   : > { %p886_p10 = pnand %p884_p9, %p872_p13  ;;  %p893_p0 = por %p892_p12, %p891_p2 }
  0x2c   : > { %p887_p1 = pneg %p886_p10 }
  0x2e   : > { %p894_p6 = pnand %p893_p0, %p887_p1 }
  0x30   : > { %897 = shalt.err (!%p894_p6)
}
  0x31   : > { %s1100_s23 = smov 256   ;;  %s1101_s29 = smov 16  }
  0x32   : > { %805 = dma.hbm_to_vmem [thread:$0]  (!%p1202_p11), %s1485_s2, 1024, %s1195_s11, [#allocation6], %s1100_s23, %s1100_s23, %s1101_s29  }
  0x33   : > { %s1486_s4 = sld [smem:[#allocation22_spill]] }
  0x39   : > { %s898_s17 = scalar_lea.hbm %s1486_s4, 512 }
  0x3a   : > { %p899_p2 = scmp.ne.s32.totalorder %s1486_s4, %s898_s17  ;;  %p905_p10 = scmp.lt.u32.totalorder %s898_s17, %s1486_s4 }
  0x3c   : > { %p901_p1 = pnand %p899_p2, %p872_p13 }
  0x3e   : > { %p902_p6 = pneg %p901_p1 }
  0x40   : > { %p907_p3 = pnand %p905_p10, %p902_p6 }
  0x42   : > { %910 = shalt.err (!%p907_p3)
}
  0x43   : > { %s911_s11 = scalar_lea.vmem %s1206_s14, 512  ;;  %p919_p12 = scmp.lt.s32.totalorder %s1206_s14, %s1206_s14 }
  0x44   : > { %p912_p5 = scmp.ne.s32.totalorder %s1206_s14, %s911_s11  ;;  %p920_p0 = scmp.lt.s32.totalorder %s911_s11, %s911_s11 }
  0x46   : > { %p914_p7 = pnand %p912_p5, %p872_p13  ;;  %p921_p2 = por %p920_p0, %p919_p12 }
  0x48   : > { %p915_p9 = pneg %p914_p7 }
  0x4a   : > { %p922_p1 = pnand %p921_p2, %p915_p9 }
  0x4c   : > { %925 = shalt.err (!%p922_p1)
}
  0x4d   : > { %s1102_s22 = smov 128   ;;  %s1103_s23 = smov 8  }
  0x4e   : > { %808 = dma.hbm_to_vmem [thread:$0]  (!%p1202_p11), %s1486_s4, 512, %s1206_s14, [#allocation9], %s1102_s22, %s1102_s22, %s1103_s23  }
  0x4f   : > { %s1261_s13 = sadd.s32 1, %s1096_s27   ;;  %s38_s16 = sadd.s32 1, %s1092_s26 }
  0x50   : > { %s35_s15 = ssub.s32 %s1096_s27, %s1261_s13  ;;  %p45_p6 = scmp.ne.s32.totalorder %s1092_s26, %s1088_s25 }
  0x51   : > { %p36_p13 = scmp.eq.s32.totalorder %s35_s15, 0  ;;  %p46_p10 = scmp.eq.s32.totalorder %s1096_s27, 0 }
  0x52   : > { %p1488_p5 = scmp.eq.s32.totalorder %s1172_s28, 1  ;;  %p825_p9 = scmp.lt.s32.totalorder %s1096_s27, 2 }
  0x53   : > { %s1270_s17 = scalar_select %p36_p13, %s1092_s26, %s38_s16  }
  0x54   : > { %p47_p3 = por %p46_p10, %p45_p6  ;;  %p1274_p7 = por %p1488_p5, %p45_p6 }
  0x55   : > { %1487 = sst [smem:[#allocation20_spill]] %s1270_s17  ;;  %s269_s12 = sand.u32 1, %s1092_s26  }
  0x56   : > { %s1489_s18 = scalar_select %p1274_p7, 1, 0 }
  0x57   : > { %s1280_s14 = sshll.u32 %s269_s12, 3  ;;  %s737_s19 = sshll.u32 %s1096_s27, 7 }
  0x58   : > { %s1286_s11 = scalar_lea.hbm %s1465_s0, %s737_s19  ;;  %s273_s22 = scalar_lea.vmem [#allocation2], %s1280_s14 }
  0x59   : > { %s280_s23 = sshll.u32 %s273_s22, 4  ;;  %p1291_p11 = pnand %p825_p9, %p47_p3  ;;  %s1289_s23 = int_to_ptr.vmem [resolvable:$true] %s280_s23 }
  0x5a   : > { %s1298_s16 = scalar_lea.hbm %s1466_s1, %s737_s19  ;;  %s287_s20 = sand.u32 1, %s1096_s27  }
  0x5b   : > { %s270_s21 = scalar_lea.sflag [#allocation3], %s269_s12  ;;  %s926_s2 = scalar_lea.hbm %s1286_s11, 128 }
  0x5c   : > { %p927_p12 = scmp.ne.s32.totalorder %s1286_s11, %s926_s2  ;;  %p928_p0 = pneg %p1291_p11 }
  0x5d   : > { %s931_s17 = scalar_lea.hbm %s1465_s0, 256  ;;  %p932_p13 = scmp.lt.u32.totalorder %s1286_s11, %s1465_s0 }
  0x5e   : > { %p929_p2 = pnand %p928_p0, %p927_p12  ;;  %p933_p6 = scmp.lt.u32.totalorder %s931_s17, %s926_s2 }
  0x5f   : > { %p935_p3 = scmp.lt.u32.totalorder %s926_s2, %s1286_s11 }
  0x60   : > { %p930_p1 = pneg %p929_p2  ;;  %p934_p10 = por %p933_p6, %p932_p13 }
  0x62   : > { %p936_p5 = por %p935_p3, %p934_p10 }
  0x64   : > { %p937_p9 = pnand %p936_p5, %p930_p1 }
  0x66   : > { %940 = shalt.err (!%p937_p9)
}
  0x67   : > { %s941_s12 = scalar_lea.vmem %s1289_s23, 128  ;;  %s1104_s4 = smov [#allocation2]  }
  0x68   : > { %p942_p12 = scmp.ne.s32.totalorder %s1289_s23, %s941_s12  ;;  %s946_s19 = sshll.u32 %s1104_s4, 4  ;;  %s947_s19 = int_to_ptr.vmem [resolvable:$false] %s946_s19 }
  0x69   : > { %s948_s26 = scalar_lea.vmem %s947_s19, 256  ;;  %p949_p4 = scmp.lt.s32.totalorder %s1289_s23, %s947_s19 }
  0x6a   : > { %p944_p2 = pnand %p942_p12, %p928_p0  ;;  %p950_p13 = scmp.lt.s32.totalorder %s948_s26, %s941_s12 }
  0x6c   : > { %p945_p7 = pneg %p944_p2  ;;  %p951_p6 = por %p950_p13, %p949_p4 }
  0x6e   : > { %p952_p10 = pnand %p951_p6, %p945_p7 }
  0x70   : > { %955 = shalt.err (!%p952_p10)
}
  0x71   : > { %812 = dma.hbm_to_vmem [thread:$0]  (!%p1291_p11), %s1286_s11, 128, %s1289_s23, %s270_s21  }
  0x72   : > { %s291_s2 = scalar_lea.vmem [#allocation5], %s1280_s14  ;;  %s288_s15 = scalar_lea.sflag [#allocation6], %s287_s20 }
  0x73   : > { %s298_s17 = sshll.u32 %s291_s2, 4  ;;  %s956_s22 = scalar_lea.hbm %s1298_s16, 128  ;;  %s299_s17 = int_to_ptr.vmem [resolvable:$true] %s298_s17 }
  0x74   : > { %p957_p4 = scmp.ne.s32.totalorder %s1298_s16, %s956_s22  ;;  %s961_s4 = scalar_lea.hbm %s1466_s1, 256 }
  0x75   : > { %p962_p3 = scmp.lt.u32.totalorder %s1298_s16, %s1466_s1  ;;  %p963_p5 = scmp.lt.u32.totalorder %s961_s4, %s956_s22 }
  0x76   : > { %p959_p7 = pnand %p957_p4, %p928_p0  ;;  %p965_p12 = scmp.lt.u32.totalorder %s956_s22, %s1298_s16 }
  0x77   : > { %p964_p9 = por %p963_p5, %p962_p3 }
  0x78   : > { %p960_p1 = pneg %p959_p7 }
  0x79   : > { %p966_p2 = por %p965_p12, %p964_p9 }
  0x7b   : > { %p967_p13 = pnand %p966_p2, %p960_p1 }
  0x7d   : > { %970 = shalt.err (!%p967_p13)
}
  0x7e   : > { %s971_s14 = scalar_lea.vmem %s299_s17, 128  ;;  %s1105_s11 = smov [#allocation5]  }
  0x7f   : > { %p972_p6 = scmp.ne.s32.totalorder %s299_s17, %s971_s14  ;;  %s976_s23 = sshll.u32 %s1105_s11, 4  ;;  %s977_s23 = int_to_ptr.vmem [resolvable:$false] %s976_s23 }
  0x80   : > { %s978_s20 = scalar_lea.vmem %s977_s23, 256  ;;  %p979_p7 = scmp.lt.s32.totalorder %s299_s17, %s977_s23 }
  0x81   : > { %p974_p10 = pnand %p972_p6, %p928_p0  ;;  %p980_p8 = scmp.lt.s32.totalorder %s978_s20, %s971_s14 }
  0x83   : > { %p975_p4 = pneg %p974_p10  ;;  %p981_p3 = por %p980_p8, %p979_p7 }
  0x85   : > { %p982_p5 = pnand %p981_p3, %p975_p4 }
  0x87   : > { %985 = shalt.err (!%p982_p5)
}
  0x88   : > { %815 = dma.hbm_to_vmem [thread:$0]  (!%p1291_p11), %s1298_s16, 128, %s299_s17, %s288_s15  }
  0x89   : > { %p1491_p1 = scmp.ne.s32.totalorder %s1483_s9, 0 }
  0x8a   : > { %s1351_s21 = sand.u32 (!%p1491_p1), 1, %s1088_s25   ;;  %p1492_p8 = scmp.ne.s32.totalorder (!%p1491_p1), %s1481_s30, 0 }
  0x8b   : > { %307 = sbr.rel (%p1491_p1) target bundleno = 422 (0x1a6), region = 44  ;;  %s1354_s2 = sshll.u32 (!%p1491_p1), %s1351_s21, 3 }
  0x8c   : > { %s310_s22 = scalar_lea.sflag (!%p1491_p1), [#allocation3], %s1351_s21  ;;  %s313_s10 = scalar_lea.vmem (!%p1491_p1), [#allocation2], %s1354_s2 }
  0x92   : > { %1059 = dma.done.wait (%p1492_p8), %s310_s22, 128  }
  0x93   : > { %1061 = vsyncadd (%p1492_p8), %s310_s22, 4294967168  ;;  %s318_s9 = sand.u32 1, %s1172_s28   ;;  %s322_s16 = scalar_lea.vmem [#allocation5], %s1354_s2 }
  0x94   : > { %s319_s29 = scalar_lea.sflag [#allocation6], %s318_s9 }
  0x95   : > { %1063 = dma.done.wait (%p1492_p8), %s319_s29, 128  }
  0x96   : > { %1065 = vsyncadd (%p1492_p8), %s319_s29, 4294967168  ;;  %p1493_p11 = scmp.eq.s32.totalorder %s1172_s28, 0 }
  0x98   : > { %1067 = dma.done.wait (%p1493_p11), [#allocation6], 1024   ;;  %p1494_p0 = pmov %p1493_p11 }
  0x9a   : > { %1069 = vsyncadd (%p1494_p0), [#allocation6], 4294966272  ;;  %p1495_p9 = pmov %p1494_p0 }
  0x9b   : > { %p1496_p12 = pmov %p1494_p0 }
  0x9c   : > { %1071 = dma.done.wait (%p1495_p9), [#allocation9], 512  }
  0x9d   : > { %1073 = vsyncadd (%p1496_p12), [#allocation9], 4294966784  ;;  %v1106_v0 = vmov 0.0|0.0   ;;  %vm1107_vm0 = vmmov 0   ;;  %v1108_v1 = vmov 0.0   ;;  %v374_v2 = vld [vmem:[#allocation7 + $0x8] sm:$0xff]  ;;  %v383_v22 = vlaneseq }
  0x9e   : > { %780 = vmatprep.subr.bf16.mxu1 %v1106_v0  ;;  %769 = vmatprep.mubr.msk.f32.mxu1 %vm1107_vm0, %v1108_v1  ;;  %v376_v3 = vld [vmem:[#allocation7 + $0x18] sm:$0xff]  ;;  %v468_v4 = vld [vmem:[#allocation8] sm:$0xff]  ;;  %v469_v6 = vld [vmem:[#allocation8 + $0x8] sm:$0xff]  ;;  %vm393_vm1 = vcmask 261120   ;;  %s752_s4 = sshll.u32 %s1172_s28, 7  ;;  %s370_s19 = scalar_lea.vmem [#allocation11], %s1354_s2 }
  0x9f   : > { %461 = vmatprep.mubr.f32.mxu0 %v1108_v1  ;;  %v772_v5 = vpack.c.bf16 %v376_v3, %v374_v2  ;;  %v373_v7 = vld [vmem:[#allocation7] sm:$0xff]  ;;  %v375_v8 = vld [vmem:[#allocation7 + $0x10] sm:$0xff]  ;;  %v781_v9 = vpack.c.bf16 %v469_v6, %v468_v4  ;;  %v378_v11 = vld [vmem:[#allocation7 + $0x28] sm:$0xff]  ;;  %v384_v23 = vshrl.u32 %v383_v22, 7  ;;  %s587_s26 = sshll.u32 %s370_s19, 4  ;;  %s363_s14 = scalar_lea.vmem [#allocation10], %s1354_s2  ;;  %s1394_s26 = int_to_ptr.vmem [resolvable:$true] %s587_s26 }
  0xa0   : > { %v774_v10 = vpack.c.bf16 %v375_v8, %v373_v7  ;;  %v380_v12 = vld [vmem:[#allocation7 + $0x38] sm:$0xff]  ;;  %v470_v13 = vld [vmem:[#allocation8 + $0x10] sm:$0xff]  ;;  %v377_v16 = vld [vmem:[#allocation7 + $0x20] sm:$0xff]  ;;  %s574_s11 = sshll.u32 %s363_s14, 4  ;;  %s1392_s22 = scalar_lea.hbm %s1472_s7, %s752_s4  ;;  %s1401_s11 = int_to_ptr.vmem [resolvable:$true] %s574_s11 }
  0xa1   : > { %773 = vmatprep.subr.bf16.mxu0 %v772_v5  ;;  %v776_v14 = vpack.c.bf16 %v380_v12, %v378_v11  ;;  %v471_v15 = vld [vmem:[#allocation8 + $0x18] sm:$0xff]  ;;  %v379_v17 = vld [vmem:[#allocation7 + $0x30] sm:$0xff]  ;;  %782 = vmatpush3.bf16.msra.mxu1 %v781_v9  ;;  %v371_v21 = vld [vmem:[%s313_s10] sm:$0xff]  ;;  %v385_v24 = vsub.s32 0, %v384_v23  ;;  %v389_v26 = vsub.s32 1, %v384_v23  ;;  %s1399_s10 = scalar_lea.hbm %s1471_s6, %s752_s4  ;;  %s561_s9 = scalar_lea.sflag [#allocation12], %s1351_s21 }
  0xa2   : > { %775 = vmatpush1.bf16.msra.mxu0 %v774_v10  ;;  %v784_v18 = vpack.c.bf16 %v471_v15, %v470_v13  ;;  %v778_v19 = vpack.c.bf16 %v379_v17, %v377_v16  ;;  %783 = vmatprep.subr.bf16.mxu1 %v1106_v0  ;;  %v372_v20 = vld [vmem:[%s322_s16] sm:$0xff]  ;;  %v381_v25 = vld [vmem:[%s1468_s3] sm:$0x3]  ;;  %s986_s29 = scalar_lea.vmem %s1394_s26, 128  ;;  %p1497_p13 = scmp.ne.s32.totalorder %s1489_s18, 0 }
  0xa3   : > { %777 = vmatprep.subr.bf16.mxu0 %v776_v14  ;;  %v386_v27 = vrot.slane %v381_v25, %v385_v24  ;;  %v748_v28 = vld [vmem:[%s1470_s5] ss:$0 sm:$0xff]  ;;  %v390_v29 = vrot.slane %v381_v25, %v389_v26  ;;  %p987_p2 = scmp.ne.s32.totalorder %s1394_s26, %s986_s29  ;;  %s1109_s16 = smov [#allocation11]  }
  0xa4   : > { %s990_s30 = sshll.u32 %s1109_s16, 4  ;;  %s991_s30 = int_to_ptr.vmem [resolvable:$false] %s990_s30 }
  0xa5   : > { %785 = vmatpush3.bf16.msra.mxu1 %v784_v18  ;;  %p988_p6 = pnand %p987_p2, %p1497_p13  ;;  %s992_s17 = scalar_lea.vmem %s991_s30, 256 }
  0xa6   : > { %779 = vmatpush1.bf16.msra.mxu0 %v778_v19  ;;  %p993_p4 = scmp.lt.s32.totalorder %s1394_s26, %s991_s30  ;;  %p994_p7 = scmp.lt.s32.totalorder %s992_s17, %s986_s29 }
  0xa7   : > { %p989_p10 = pneg %p988_p6 }
  0xa8   : > { %770 = vmatmul.mubr.msk.f32.vlgmr.msra.gmra.mrb[0].mxu1 %vm393_vm1, %v372_v20  ;;  %p995_p3 = por %p994_p7, %p993_p4 }
  0xa9   : > { %747 = vmatmul.mubr.msk.f32.vlgmr.msra.gmra.mrb[0].mxu0 %vm393_vm1, %v371_v21 }
  0xaa   : > { %p996_p5 = pnand %p995_p3, %p989_p10 }
 0x17b   : > { %v548_v30 = vpop.f32.mrb[0].mxu1 }
 0x17c   : > { %v463_v31 = vpop.f32.mrb[0].mxu0  ;;  %v549_v32 = vadd.f32 %v748_v28, %v548_v30  ;;  %v771_v34 = vpop.f32.mrb[1].mxu1 }
 0x17d   : > { %v464_v33 = vadd.f32 %v463_v31, %v386_v27  ;;  %v465_v35 = vpop.f32.mrb[1].mxu0 }
 0x17e   : > { %v466_v36 = vadd.f32 %v465_v35, %v390_v29 }
 0x17f   : > { %v552_v37 = vmul.f32 %v549_v32, %v464_v33 }
 0x180   : > { %554 = vst [vmem:[%s370_s19] sm:$0xff] %v466_v36 }
 0x181   : > { %553 = vst [vmem:[%s363_s14] sm:$0xff] %v552_v37 }
 0x182   : > { %999 = shalt.err (!%p996_p5)
}
 0x183   : > { %s1000_s15 = scalar_lea.hbm %s1392_s22, 128  ;;  %s1004_s19 = scalar_lea.hbm %s1472_s7, 256 }
 0x184   : > { %p1001_p1 = scmp.ne.s32.totalorder %s1392_s22, %s1000_s15  ;;  %p1005_p0 = scmp.lt.u32.totalorder %s1392_s22, %s1472_s7 }
 0x185   : > { %p1006_p9 = scmp.lt.u32.totalorder %s1004_s19, %s1000_s15  ;;  %p1008_p2 = scmp.lt.u32.totalorder %s1000_s15, %s1392_s22 }
 0x186   : > { %p1002_p8 = pnand %p1001_p1, %p1497_p13 }
 0x187   : > { %p1007_p12 = por %p1006_p9, %p1005_p0 }
 0x188   : > { %p1003_p11 = pneg %p1002_p8 }
 0x189   : > { %p1009_p6 = por %p1008_p2, %p1007_p12 }
 0x18b   : > { %p1010_p10 = pnand %p1009_p6, %p1003_p11 }
 0x18d   : > { %1013 = shalt.err (!%p1010_p10)
}
 0x18e   : > { %799 = dma.vmem_to_hbm [thread:$0]  (%p1497_p13), %s1394_s26, 128, %s1392_s22, %s561_s9  }
 0x18f   : > { %s556_s20 = scalar_lea.sflag [#allocation4], %s1351_s21  ;;  %s1014_s28 = scalar_lea.vmem %s1401_s11, 128 }
 0x190   : > { %p1015_p4 = scmp.ne.s32.totalorder %s1401_s11, %s1014_s28  ;;  %s1110_s2 = smov [#allocation10]  }
 0x191   : > { %s1018_s29 = sshll.u32 %s1110_s2, 4  ;;  %s1019_s29 = int_to_ptr.vmem [resolvable:$false] %s1018_s29 }
 0x192   : > { %p1016_p7 = pnand %p1015_p4, %p1497_p13  ;;  %s1020_s16 = scalar_lea.vmem %s1019_s29, 256 }
 0x193   : > { %p1021_p5 = scmp.lt.s32.totalorder %s1401_s11, %s1019_s29  ;;  %p1022_p1 = scmp.lt.s32.totalorder %s1020_s16, %s1014_s28 }
 0x194   : > { %p1017_p3 = pneg %p1016_p7 }
 0x195   : > { %p1023_p8 = por %p1022_p1, %p1021_p5 }
 0x197   : > { %p1024_p11 = pnand %p1023_p8, %p1017_p3 }
 0x199   : > { %1027 = shalt.err (!%p1024_p11)
}
 0x19a   : > { %s1028_s21 = scalar_lea.hbm %s1399_s10, 128  ;;  %s1032_s9 = scalar_lea.hbm %s1471_s6, 256 }
 0x19b   : > { %p1029_p0 = scmp.ne.s32.totalorder %s1399_s10, %s1028_s21  ;;  %p1033_p2 = scmp.lt.u32.totalorder %s1399_s10, %s1471_s6 }
 0x19c   : > { %p1034_p6 = scmp.lt.u32.totalorder %s1032_s9, %s1028_s21  ;;  %p1036_p4 = scmp.lt.u32.totalorder %s1028_s21, %s1399_s10 }
 0x19d   : > { %p1030_p9 = pnand %p1029_p0, %p1497_p13 }
 0x19e   : > { %p1035_p10 = por %p1034_p6, %p1033_p2 }
 0x19f   : > { %p1031_p12 = pneg %p1030_p9 }
 0x1a0   : > { %p1037_p7 = por %p1036_p4, %p1035_p10 }
 0x1a2   : > { %p1038_p3 = pnand %p1037_p7, %p1031_p12 }
 0x1a4   : > { %1041 = shalt.err (!%p1038_p3)
}
 0x1a5   : > { %798 = dma.vmem_to_hbm [thread:$0]  (%p1497_p13), %s1401_s11, 128, %s1399_s10, %s556_s20  }
 0x1a6 PF: > { %s599_s15 = sand.u32 1, %s1084_s24   ;;  %p1498_p5 = scmp.ne.s32.totalorder %s1482_s8, 0 }
 0x1a7   : > { %p1499_p1 = scmp.ge.s32.totalorder %s1096_s27, 2  ;;  %s600_s12 = scalar_lea.sflag [#allocation4], %s599_s15 }
 0x1a9   : > { %p817_p8 = pnand %p1499_p1, %p1498_p5 }
 0x1ab   : > { %1075 = dma.done.wait (!%p817_p8), %s600_s12, 128  }
 0x1ac   : > { %1077 = vsyncadd (!%p817_p8), %s600_s12, 4294967168  ;;  %s609_s4 = scalar_lea.sflag [#allocation12], %s599_s15 }
 0x1ad   : > { %1079 = dma.done.wait (!%p817_p8), %s609_s4, 128  }
 0x1ae   : > { %1081 = vsyncadd (!%p817_p8), %s609_s4, 4294967168  ;;  %s1500_s18 = sld [smem:[#allocation19_spill]]  ;;  %s1501_s26 = sld [smem:[#allocation20_spill]] }
 0x1af   : > { %p28_p13 = scmp.ge.s32.totalorder %s1261_s13, 4   ;;  %s1502_s24 = smov %s1088_s25 }
 0x1b0   : > { %s1504_s27 = smov %s1261_s13 }
 0x1b1   :  { %30 = sbr.rel (!%p28_p13) target bundleno = 13 (0xd), region = 127 }
 0x1b4   : > { %s1503_s25 = smov %s1500_s18 }
 0x1b8   :  { %614 = vsyncpa [#allocation3], 1 }
 0x1b9   :  { %616 = vsyncpa [#allocation3 + $0x1], 1 }
 0x1ba   :  { %617 = vsyncpa [#allocation6], 1 }
 0x1bb   :  { %619 = vsyncpa [#allocation6 + $0x1], 1 }
 0x1bc   :  { %620 = vsyncpa [#allocation9], 1 }
 0x1bd   :  { %621 = vsyncpa [#allocation4], 1 }
 0x1be   :  { %623 = vsyncpa [#allocation4 + $0x1], 1 }
 0x1bf   :  { %624 = vsyncpa [#allocation12], 1 }
 0x1c0   :  { %626 = vsyncpa [#allocation12 + $0x1], 1 }

</bundles_post_ra>
